<compile_context>
chip_gen: v7x
topology: tpu7x:2x2x1
jax: 0.10.0
libtpu: 0.0.40
codegen_flags: <defaults>
</compile_context>

<pallas_src>
import jax
import jax.numpy as jnp
from jax.experimental import pallas as pl
from jax.experimental.pallas import tpu as pltpu

_LANE = 128


def _packed_sublane(dtype) -> int:
    """Packed sublane tile: 8 for 32-bit, 16 for 16-bit, 32 for 8-bit dtypes."""
    itemsize = jnp.dtype(dtype).itemsize
    return max(8, 32 // itemsize)


def _drop_path_kernel(scale_ref, x_ref, o_ref):
    """One grid step = one (tr, 128) slab; scale_ref is a (tr, 1) f32 column."""
    o_ref[...] = (x_ref[...] * scale_ref[...]).astype(o_ref.dtype)


def drop_path_pallas(x, drop_prob, key, training=True, *, target_block_bytes=4 << 20):
    """Pallas implementation of DropPath.forward for (B, ...) inputs."""
    if drop_prob == 0.0 or not training:
        return x

    keep_prob = 1.0 - drop_prob
    B = x.shape[0]
    F = 1
    for d in x.shape[1:]:
        F *= d

    # Per-sample scale in f32: floor(keep_prob + U[0,1)) / keep_prob -> 0 or 1/keep.
    rand = jax.random.uniform(key, (B,), dtype=jnp.float32)
    scale = jnp.floor(jnp.float32(keep_prob) + rand) / jnp.float32(keep_prob)

    itemsize = jnp.dtype(x.dtype).itemsize
    sub = _packed_sublane(x.dtype)

    rows_per_sample = pl.cdiv(F, _LANE)          # ceil(F / 128)
    f_pad = rows_per_sample * _LANE
    total_rows = B * rows_per_sample

    x_flat = x.reshape(B, F)
    if f_pad != F:
        # TODO(synk): ragged tail (F % 128 != 0) still pays a pad pass on the
        # input and a slice pass on the output; the common F % 128 == 0 path
        # below has neither.
        x_flat = jnp.pad(x_flat, ((0, 0), (0, f_pad - F)))
    x2 = x_flat.reshape(total_rows, _LANE)       # contiguous -> free bitcast

    # One f32 scale scalar per 128-lane row (negligible extra traffic).
    scale_rows = jnp.repeat(scale, rows_per_sample).reshape(total_rows, 1)

    # Row tile: ~target_block_bytes per x block, multiple of the packed sublane
    # tile so stores are unmasked.  Boundary block (total_rows % tr) is masked
    # by Pallas automatically.
    tr = max(sub, (target_block_bytes // (_LANE * itemsize)) // sub * sub)
    if tr >= total_rows:
        if total_rows >= 2 * sub:
            # Whole tensor fits in one block: split in two so v7x's two
            # TensorCores both get work on this "parallel" axis.
            tr = pl.cdiv(pl.cdiv(total_rows, 2), sub) * sub
        else:
            # Tiny input: a single block equal to the full array is legal.
            tr = total_rows
    grid = (pl.cdiv(total_rows, tr),)

    out2 = pl.pallas_call(
        _drop_path_kernel,
        out_shape=jax.ShapeDtypeStruct((total_rows, _LANE), x.dtype),
        grid=grid,
        in_specs=[
            pl.BlockSpec((tr, 1), lambda i: (i, 0)),        # per-row scale (f32)
            pl.BlockSpec((tr, _LANE), lambda i: (i, 0)),    # x slab
        ],
        out_specs=pl.BlockSpec((tr, _LANE), lambda i: (i, 0)),
        compiler_params=pltpu.CompilerParams(
            dimension_semantics=("parallel",),
            vmem_limit_bytes=32 * 1024 * 1024,
        ),
    )(scale_rows, x2)

    if f_pad != F:
        return out2.reshape(B, f_pad)[:, :F].reshape(x.shape)
    return out2.reshape(x.shape)


def _reference(x, drop_prob, key):
    """Pure-JAX reference with identical RNG usage."""
    keep_prob = 1.0 - drop_prob
    rand = jax.random.uniform(key, (x.shape[0],), dtype=jnp.float32)
    mask = jnp.floor(jnp.float32(keep_prob) + rand)
    bshape = (x.shape[0],) + (1,) * (x.ndim - 1)
    return (x / keep_prob * mask.reshape(bshape)).astype(x.dtype)


if __name__ == "__main__":
    key = jax.random.PRNGKey(0)
    k_x, k_mask, k_x2, k_mask2 = jax.random.split(key, 4)

    drop_prob = 0.5

    # Main check: ViT-ish shape, F = 8*32 = 256 (F % 128 == 0 -> no pad/slice).
    B, N, D = 2, 8, 32
    x = jax.random.normal(k_x, (B, N, D), dtype=jnp.float32)
    out = jax.block_until_ready(drop_path_pallas(x, drop_prob, k_mask, training=True))
    ref = _reference(x, drop_prob, k_mask)
    assert out.shape == x.shape and out.dtype == x.dtype
    assert jnp.allclose(out, ref, atol=1e-6, rtol=1e-6)

    # Ragged-tail fallback path (F % 128 != 0).
    x_r = jax.random.normal(k_x2, (3, 5, 7), dtype=jnp.float32)
    out_r = jax.block_until_ready(drop_path_pallas(x_r, drop_prob, k_mask2, training=True))
    ref_r = _reference(x_r, drop_prob, k_mask2)
    assert out_r.shape == x_r.shape and out_r.dtype == x_r.dtype
    assert jnp.allclose(out_r, ref_r, atol=1e-6, rtol=1e-6)

    # Eval / drop_prob=0 path is the identity.
    out_eval = drop_path_pallas(x, drop_prob, k_mask, training=False)
    assert jnp.array_equal(out_eval, x)
    out_p0 = drop_path_pallas(x, 0.0, k_mask, training=True)
    assert jnp.array_equal(out_p0, x)

    print("KERNEL_OK")
</pallas_src>

<mosaic_0001>
module attributes {stable_mosaic.version = 11 : i64} {
  func.func @_drop_path_kernel(%arg0: i32, %arg1: memref<4x1xf32, #tpu.memory_space<vmem>>, %arg2: memref<4x128xf32, #tpu.memory_space<vmem>>, %arg3: memref<4x128xf32, #tpu.memory_space<vmem>>) attributes {dimension_semantics = [#tpu.dimension_semantics<parallel>], iteration_bounds = array<i64: 1>, scalar_prefetch = 0 : i64, scratch_operands = 0 : i64, tpu.core_type = #tpu.core_type<tc>, window_params = [{transform_indices = @transform_0, window_bounds = array<i64: 4, 1>}, {transform_indices = @transform_1, window_bounds = array<i64: 4, 128>}, {transform_indices = @transform_2, window_bounds = array<i64: 4, 128>}]} {
    %c0 = arith.constant 0 : index
    %c0_0 = arith.constant 0 : index
    %0 = vector.load %arg2[%c0, %c0_0] : memref<4x128xf32, #tpu.memory_space<vmem>>, vector<4x128xf32>
    %c0_1 = arith.constant 0 : index
    %c0_2 = arith.constant 0 : index
    %1 = vector.load %arg1[%c0_1, %c0_2] : memref<4x1xf32, #tpu.memory_space<vmem>>, vector<4x1xf32>
    %2 = vector.broadcast %1 : vector<4x1xf32> to vector<4x128xf32>
    %3 = arith.mulf %0, %2 : vector<4x128xf32>
    %c0_3 = arith.constant 0 : index
    %c0_4 = arith.constant 0 : index
    %4 = vector.load %arg3[%c0_3, %c0_4] : memref<4x128xf32, #tpu.memory_space<vmem>>, vector<4x128xf32>
    tpu.vector_store %arg3[%c0_3, %c0_4], %3 {strides = array<i32>} : memref<4x128xf32, #tpu.memory_space<vmem>>, vector<4x128xf32>,
    return
  }
  func.func @transform_0(%arg0: i32) -> (i32, i32) {
    %c0_i32 = arith.constant 0 : i32
    %c0_i32_0 = arith.constant 0 : i32
    return %arg0, %c0_i32 : i32, i32
  }
  func.func @transform_1(%arg0: i32) -> (i32, i32) {
    %c0_i32 = arith.constant 0 : i32
    %c0_i32_0 = arith.constant 0 : i32
    return %arg0, %c0_i32 : i32, i32
  }
  func.func @transform_2(%arg0: i32) -> (i32, i32) {
    %c0_i32 = arith.constant 0 : i32
    %c0_i32_0 = arith.constant 0 : i32
    return %arg0, %c0_i32 : i32, i32
  }
}

</mosaic_0001>

<bundles_post_ra>
// kernel: tpu_custom_call.1
= control target key start
LH: loop header
LB: loop body
LE: loop exit
PB: predicated region body
PF: predicated region fallthrough
CT: control target
= control target key end

     0   :  { %s97_s0 = inlined_call_operand.vmem [shape: f32[4,1], index: 0, kind: input, shape index: {}]   ;;  %s98_s1 = inlined_call_operand.vmem [shape: f32[4,128], index: 1, kind: input, shape index: {}]   ;;  %s99_s2 = inlined_call_operand.hbm [shape: f32[4,128], index: 2, kind: output, shape index: {}]  }
   0x1   :  { %v13_v0 = vld [vmem:[%s97_s0] sm:$0xf] }
   0x2   :  { %7 = vsyncpa [#allocation3], 0  ;;  %v62_v1 = vmov 0   ;;  %v12_v2 = vld [vmem:[%s98_s1] sm:$0xf]  ;;  %s63_s13 = smov [#allocation2]  }
   0x3   :  { %37 = vset.pattern.permute.xlu0 %v62_v1  ;;  %s27_s14 = sshll.u32 %s63_s13, 4  ;;  %s28_s14 = int_to_ptr.vmem [resolvable:$true] %s27_s14 }
   0x4   :  { %16 = vperm.xlu0 %37, %v13_v0   ;;  %s38_s15 = scalar_lea.vmem %s28_s14, 64  ;;  %p43_p1 = scmp.lt.s32.totalorder %s28_s14, %s28_s14 }
   0x5   :  { %p39_p0 = scmp.ne.s32.totalorder %s28_s14, %s38_s15  ;;  %p44_p2 = scmp.lt.s32.totalorder %s38_s15, %s38_s15 }
   0x7   :  { %p45_p3 = por %p44_p2, %p43_p1 }
   0x9   :  { %p46_p4 = pnand %p45_p3, %p39_p0 }
  0x83   :  { %v17_v3 = vpop.permute.xlu0 %16 }
  0x84   :  { %v19_v4 = vmul.f32 %v17_v3, %v12_v2 }
  0x86   :  { %20 = vst [vmem:[#allocation2] sm:$0xf] %v19_v4 }
  0x87   :  { %49 = shalt.err (!%p46_p4)
}
  0x88   :  { %s50_s17 = scalar_lea.hbm %s99_s2, 64 }
  0x89   :  { %p51_p5 = scmp.ne.s32.totalorder %s99_s2, %s50_s17  ;;  %p54_p6 = scmp.lt.u32.totalorder %s50_s17, %s99_s2 }
  0x8b   :  { %p56_p7 = pnand %p54_p6, %p51_p5 }
  0x8d   :  { %59 = shalt.err (!%p56_p7)
}
  0x8e   :  { %30 = dma.vmem_to_hbm [thread:$0]  %s28_s14, 64, %s99_s2, [#allocation3]  }
  0x8f   :  { %60 = dma.done.wait [#allocation3], 64  }
  0x90   :  { %61 = vsyncadd [#allocation3], 4294967232 }
  0x91   :  { %34 = vsyncpa [#allocation3], 1 }

</bundles_post_ra>
